<compile_context>
chip_gen: v5e
topology: v5e:2x2
jax: 0.10.0
libtpu: 0.0.40
codegen_flags: <defaults>
</compile_context>

<pallas_src>
import numpy as np
import jax
import jax.numpy as jnp
from jax import lax
from jax.experimental import pallas as pl
from jax.experimental.pallas import tpu as pltpu


_MAX_W_BLOCK = 512  # lane-axis block cap; multiples of 128 keep stores unmasked


def _make_combine_kernel(f: int, fc: int):
    """Kernel combining separable sin/cos tables into the (2F, Ht, Wt) block."""
    n_chunks = f // fc

    def kernel(xt_ref, yt_ref, out_ref):
        # xt_ref : (F, 2, Wt)   [:, 0, :] = sin(X), [:, 1, :] = cos(X)
        # yt_ref : (F, Ht, 2)   [..., 0]  = sin(Y), [..., 1]  = cos(Y)
        # out_ref: (2F, Ht, Wt) rows [0, F) = sin(X+Y), rows [F, 2F) = cos(X+Y)
        def body(c, carry):
            off = pl.multiple_of(c * fc, fc)
            xt = xt_ref[pl.ds(off, fc)]            # (fc, 2, Wt)
            yt = yt_ref[pl.ds(off, fc)]            # (fc, Ht, 2)
            sx = xt[:, 0:1, :]                     # (fc, 1, Wt)  broadcast over h
            cx = xt[:, 1:2, :]
            sy = yt[:, :, 0:1]                     # (fc, Ht, 1)  broadcast over w
            cy = yt[:, :, 1:2]
            # Angle-addition combine; temporaries are only (fc, Ht, Wt).
            out_ref[pl.ds(off, fc)] = (sx * cy + cx * sy).astype(out_ref.dtype)
            out_ref[pl.ds(f + off, fc)] = (cx * cy - sx * sy).astype(out_ref.dtype)
            return carry

        lax.fori_loop(0, n_chunks, body, None, unroll=True)

    return kernel


def _choose_blocks(h, w, f, out_itemsize, *, budget_bytes, min_grid_blocks):
    """Pick (ht, hp, wt, wp): row/col block sizes and padded extents."""
    # --- lane (w) axis: full extent unless w is very wide --------------------
    if w > _MAX_W_BLOCK:
        wt = 128
        for cand in (512, 384, 256, 128):
            if w % cand == 0:
                wt = cand
                break
    else:
        wt = w
    wp = -(-w // wt) * wt
    n_w = wp // wt

    # --- sublane (h) axis: multiple of 8, sized against total VMEM footprint -
    w_lanes = max(128, -(-wt // 128) * 128)               # VMEM lane padding
    h8 = -(-h // 8) * 8
    fixed = 2 * f * 8 * w_lanes * 4                       # xt (F,2,wt), 2 buffers
    per8 = 2 * f * 8 * 128 * 4                            # yt (F,ht,2), lane-padded
    per8 += 2 * (2 * f) * 8 * w_lanes * out_itemsize      # output block, 2 buffers
    per8 += 8 * 16 * 8 * w_lanes * 4                      # streamed f32 temps (fc<=16)
    avail = max(budget_bytes - fixed, per8)
    max_ht = max(8, (avail // per8) * 8)
    # Enough grid steps that both v7x TensorCores get work and writeback overlaps.
    target_h_blocks = max(1, -(-min_grid_blocks // n_w))
    ht_for_blocks = max(8, (h8 // target_h_blocks) // 8 * 8)
    ht = int(min(h8, max_ht, ht_for_blocks))
    hp = -(-h // ht) * ht
    return ht, hp, wt, wp


def _vmem_bytes_estimate(f, wt, ht, out_itemsize, fc):
    """Generous per-grid-step VMEM estimate (double-buffered I/O + temps)."""
    w_lanes = max(128, -(-wt // 128) * 128)
    ht8 = -(-ht // 8) * 8
    xt_b = 2 * f * 8 * w_lanes * 4
    yt_b = 2 * f * ht8 * 128 * 4
    out_b = 2 * (2 * f) * ht8 * w_lanes * out_itemsize
    tmp_b = 8 * fc * ht8 * w_lanes * 4
    return xt_b + yt_b + out_b + tmp_b + (2 << 20)


def position_embedding_random(size, gaussian_matrix, *, out_dtype=jnp.float32,
                              row_block=None, col_block=None,
                              vmem_budget_bytes=12 << 20, min_grid_blocks=4):
    """Equivalent of SAM PositionEmbeddingRandom.forward(size) (HiDecoder image_pe).

    Args:
      size: (h, w) tuple of Python ints.
      gaussian_matrix: float32 array of shape (2, num_pos_feats).
      out_dtype: output dtype; f32 matches torch, bf16 halves HBM writeback.
      row_block / col_block: optional overrides for the (h, w) block sizes.
      vmem_budget_bytes: per-grid-step VMEM target used by the block chooser
        (conservative for v5e 16 MiB / v7x 32 MiB scoped defaults).
      min_grid_blocks: minimum grid steps targeted so v7x megacore is utilized.

    Returns:
      array of shape (2 * num_pos_feats, h, w), dtype out_dtype.

    NOTE: the result depends only on (size, gaussian_matrix); cache it at the
    call site instead of recomputing every predict_masks call.
    """
    h, w = int(size[0]), int(size[1])
    f = int(gaussian_matrix.shape[1])
    itemsize = jnp.dtype(out_dtype).itemsize

    ht, hp, wt, wp = _choose_blocks(h, w, f, itemsize,
                                    budget_bytes=vmem_budget_bytes,
                                    min_grid_blocks=min_grid_blocks)
    if row_block is not None:
        ht = int(row_block)
        if ht % 8 != 0 and -(-h // ht) != 1:
            raise ValueError("row_block must be a multiple of 8 (or cover all rows)")
        hp = -(-h // ht) * ht
    if col_block is not None:
        wt = int(col_block)
        if wt % 128 != 0 and -(-w // wt) != 1:
            raise ValueError("col_block must be a multiple of 128 (or cover all cols)")
        wp = -(-w // wt) * wt
    n_h, n_w = hp // ht, wp // wt

    # --- tiny separable sin/cos tables: O(F*(h+w)) transcendentals total -----
    g = gaussian_matrix.astype(jnp.float32)
    two_pi = float(2.0 * np.pi)
    xs = (jnp.arange(wp, dtype=jnp.float32) + 0.5) * (1.0 / w)
    ys = (jnp.arange(hp, dtype=jnp.float32) + 0.5) * (1.0 / h)
    ax = (2.0 * xs - 1.0)[None, :] * (two_pi * g[0])[:, None]    # (F, wp)
    ay = (2.0 * ys - 1.0)[None, :] * (two_pi * g[1])[:, None]    # (F, hp)
    xt = jnp.stack([jnp.sin(ax), jnp.cos(ax)], axis=1)           # (F, 2, wp)
    yt = jnp.stack([jnp.sin(ay), jnp.cos(ay)], axis=-1)          # (F, hp, 2)

    fc = next(c for c in (16, 8, 4, 2, 1) if f % c == 0)
    kernel = _make_combine_kernel(f, fc)

    est = _vmem_bytes_estimate(f, wt, ht, itemsize, fc)
    vmem_limit = int(min(max(2 * est, 16 << 20), 48 << 20))

    pe = pl.pallas_call(
        kernel,
        out_shape=jax.ShapeDtypeStruct((2 * f, hp, wp), out_dtype),
        grid=(n_h, n_w),
        in_specs=[
            pl.BlockSpec((f, 2, wt), lambda i, j: (0, 0, j)),     # packed sin/cos(X)
            pl.BlockSpec((f, ht, 2), lambda i, j: (0, i, 0)),     # packed sin/cos(Y)
        ],
        out_specs=pl.BlockSpec((2 * f, ht, wt), lambda i, j: (0, i, j)),
        compiler_params=pltpu.CompilerParams(
            dimension_semantics=("parallel", "parallel"),
            vmem_limit_bytes=vmem_limit,
        ),
    )(xt, yt)

    if hp != h or wp != w:
        pe = pe[:, :h, :w]
    return pe


def _reference(size, gaussian_matrix):
    """Pure-JAX reference mirroring the PyTorch PositionEmbeddingRandom.forward."""
    h, w = size
    grid = jnp.ones((h, w), jnp.float32)
    y_embed = (jnp.cumsum(grid, axis=0) - 0.5) / h
    x_embed = (jnp.cumsum(grid, axis=1) - 0.5) / w
    coords = jnp.stack([x_embed, y_embed], axis=-1)
    coords = 2.0 * coords - 1.0
    coords = coords @ gaussian_matrix.astype(jnp.float32)
    coords = 2.0 * np.pi * coords
    pe = jnp.concatenate([jnp.sin(coords), jnp.cos(coords)], axis=-1)
    return jnp.transpose(pe, (2, 0, 1))


if __name__ == "__main__":
    key = jax.random.PRNGKey(0)
    # (h, w), num_pos_feats — small shapes that exercise, in order:
    #   row (h) tiling, ragged-h padding + slicing, lane (w) axis tiling.
    configs = [((16, 16), 32), ((10, 12), 32), ((8, 640), 16)]
    for (h, w), npf in configs:
        g = jax.random.normal(jax.random.fold_in(key, h * 1000 + w),
                              (2, npf), dtype=jnp.float32)
        pe = jax.block_until_ready(position_embedding_random((h, w), g))
        assert pe.shape == (2 * npf, h, w), pe.shape
        assert pe.dtype == jnp.float32
        ref = jax.block_until_ready(_reference((h, w), g))
        # Angle-addition identity vs direct sin(A+B): ~1e-5 abs headroom needed.
        np.testing.assert_allclose(np.asarray(pe), np.asarray(ref),
                                   rtol=1e-5, atol=5e-5)
    print("KERNEL_OK")
</pallas_src>

<mosaic_0001>
module attributes {stable_mosaic.version = 11 : i64} {
  func.func @kernel(%arg0: i32, %arg1: i32, %arg2: memref<32x2x16xf32, #tpu.memory_space<vmem>>, %arg3: memref<32x8x2xf32, #tpu.memory_space<vmem>>, %arg4: memref<64x8x16xf32, #tpu.memory_space<vmem>>) attributes {dimension_semantics = [#tpu.dimension_semantics<parallel>, #tpu.dimension_semantics<parallel>], iteration_bounds = array<i64: 2, 1>, scalar_prefetch = 0 : i64, scratch_operands = 0 : i64, tpu.core_type = #tpu.core_type<tc>, window_params = [{transform_indices = @transform_0, window_bounds = array<i64: 32, 2, 16>}, {transform_indices = @transform_1, window_bounds = array<i64: 32, 8, 2>}, {transform_indices = @transform_2, window_bounds = array<i64: 64, 8, 16>}]} {
    %c0_i32 = arith.constant 0 : i32
    %c16_i32 = arith.constant 16 : i32
    %0 = arith.muli %c0_i32, %c16_i32 : i32
    %1 = tpu.assume_multiple %0, 16 : i32
    %2 = arith.index_cast %1 : i32 to index
    %c0 = arith.constant 0 : index
    %c0_0 = arith.constant 0 : index
    %3 = vector.load %arg2[%2, %c0, %c0_0] : memref<32x2x16xf32, #tpu.memory_space<vmem>>, vector<16x2x16xf32>
    %4 = arith.index_cast %1 : i32 to index
    %c0_1 = arith.constant 0 : index
    %c0_2 = arith.constant 0 : index
    %5 = vector.load %arg3[%4, %c0_1, %c0_2] : memref<32x8x2xf32, #tpu.memory_space<vmem>>, vector<16x8x2xf32>
    %6 = vector.extract_strided_slice %3 {offsets = [0, 0, 0], sizes = [16, 1, 16], strides = [1, 1, 1]} : vector<16x2x16xf32> to vector<16x1x16xf32>
    %7 = vector.extract_strided_slice %3 {offsets = [0, 1, 0], sizes = [16, 1, 16], strides = [1, 1, 1]} : vector<16x2x16xf32> to vector<16x1x16xf32>
    %8 = vector.extract_strided_slice %5 {offsets = [0, 0, 0], sizes = [16, 8, 1], strides = [1, 1, 1]} : vector<16x8x2xf32> to vector<16x8x1xf32>
    %9 = vector.extract_strided_slice %5 {offsets = [0, 0, 1], sizes = [16, 8, 1], strides = [1, 1, 1]} : vector<16x8x2xf32> to vector<16x8x1xf32>
    %10 = vector.broadcast %6 : vector<16x1x16xf32> to vector<16x8x16xf32>
    %11 = vector.broadcast %9 : vector<16x8x1xf32> to vector<16x8x16xf32>
    %12 = arith.mulf %10, %11 : vector<16x8x16xf32>
    %13 = vector.broadcast %7 : vector<16x1x16xf32> to vector<16x8x16xf32>
    %14 = vector.broadcast %8 : vector<16x8x1xf32> to vector<16x8x16xf32>
    %15 = arith.mulf %13, %14 : vector<16x8x16xf32>
    %16 = arith.addf %12, %15 : vector<16x8x16xf32>
    %17 = arith.index_cast %1 : i32 to index
    %c0_3 = arith.constant 0 : index
    %c0_4 = arith.constant 0 : index
    %18 = vector.load %arg4[%17, %c0_3, %c0_4] : memref<64x8x16xf32, #tpu.memory_space<vmem>>, vector<16x8x16xf32>
    tpu.vector_store %arg4[%17, %c0_3, %c0_4], %16 {strides = array<i32>} : memref<64x8x16xf32, #tpu.memory_space<vmem>>, vector<16x8x16xf32>,
    %19 = vector.broadcast %7 : vector<16x1x16xf32> to vector<16x8x16xf32>
    %20 = vector.broadcast %9 : vector<16x8x1xf32> to vector<16x8x16xf32>
    %21 = arith.mulf %19, %20 : vector<16x8x16xf32>
    %22 = vector.broadcast %6 : vector<16x1x16xf32> to vector<16x8x16xf32>
    %23 = vector.broadcast %8 : vector<16x8x1xf32> to vector<16x8x16xf32>
    %24 = arith.mulf %22, %23 : vector<16x8x16xf32>
    %25 = arith.subf %21, %24 : vector<16x8x16xf32>
    %c32_i32 = arith.constant 32 : i32
    %26 = arith.addi %c32_i32, %1 : i32
    %27 = arith.index_cast %26 : i32 to index
    %c0_5 = arith.constant 0 : index
    %c0_6 = arith.constant 0 : index
    %28 = vector.load %arg4[%27, %c0_5, %c0_6] : memref<64x8x16xf32, #tpu.memory_space<vmem>>, vector<16x8x16xf32>
    tpu.vector_store %arg4[%27, %c0_5, %c0_6], %25 {strides = array<i32>} : memref<64x8x16xf32, #tpu.memory_space<vmem>>, vector<16x8x16xf32>,
    %c1_i32 = arith.constant 1 : i32
    %c16_i32_7 = arith.constant 16 : i32
    %29 = arith.muli %c1_i32, %c16_i32_7 : i32
    %30 = tpu.assume_multiple %29, 16 : i32
    %31 = arith.index_cast %30 : i32 to index
    %c0_8 = arith.constant 0 : index
    %c0_9 = arith.constant 0 : index
    %32 = vector.load %arg2[%31, %c0_8, %c0_9] : memref<32x2x16xf32, #tpu.memory_space<vmem>>, vector<16x2x16xf32>
    %33 = arith.index_cast %30 : i32 to index
    %c0_10 = arith.constant 0 : index
    %c0_11 = arith.constant 0 : index
    %34 = vector.load %arg3[%33, %c0_10, %c0_11] : memref<32x8x2xf32, #tpu.memory_space<vmem>>, vector<16x8x2xf32>
    %35 = vector.extract_strided_slice %32 {offsets = [0, 0, 0], sizes = [16, 1, 16], strides = [1, 1, 1]} : vector<16x2x16xf32> to vector<16x1x16xf32>
    %36 = vector.extract_strided_slice %32 {offsets = [0, 1, 0], sizes = [16, 1, 16], strides = [1, 1, 1]} : vector<16x2x16xf32> to vector<16x1x16xf32>
    %37 = vector.extract_strided_slice %34 {offsets = [0, 0, 0], sizes = [16, 8, 1], strides = [1, 1, 1]} : vector<16x8x2xf32> to vector<16x8x1xf32>
    %38 = vector.extract_strided_slice %34 {offsets = [0, 0, 1], sizes = [16, 8, 1], strides = [1, 1, 1]} : vector<16x8x2xf32> to vector<16x8x1xf32>
    %39 = vector.broadcast %35 : vector<16x1x16xf32> to vector<16x8x16xf32>
    %40 = vector.broadcast %38 : vector<16x8x1xf32> to vector<16x8x16xf32>
    %41 = arith.mulf %39, %40 : vector<16x8x16xf32>
    %42 = vector.broadcast %36 : vector<16x1x16xf32> to vector<16x8x16xf32>
    %43 = vector.broadcast %37 : vector<16x8x1xf32> to vector<16x8x16xf32>
    %44 = arith.mulf %42, %43 : vector<16x8x16xf32>
    %45 = arith.addf %41, %44 : vector<16x8x16xf32>
    %46 = arith.index_cast %30 : i32 to index
    %c0_12 = arith.constant 0 : index
    %c0_13 = arith.constant 0 : index
    %47 = vector.load %arg4[%46, %c0_12, %c0_13] : memref<64x8x16xf32, #tpu.memory_space<vmem>>, vector<16x8x16xf32>
    tpu.vector_store %arg4[%46, %c0_12, %c0_13], %45 {strides = array<i32>} : memref<64x8x16xf32, #tpu.memory_space<vmem>>, vector<16x8x16xf32>,
    %48 = vector.broadcast %36 : vector<16x1x16xf32> to vector<16x8x16xf32>
    %49 = vector.broadcast %38 : vector<16x8x1xf32> to vector<16x8x16xf32>
    %50 = arith.mulf %48, %49 : vector<16x8x16xf32>
    %51 = vector.broadcast %35 : vector<16x1x16xf32> to vector<16x8x16xf32>
    %52 = vector.broadcast %37 : vector<16x8x1xf32> to vector<16x8x16xf32>
    %53 = arith.mulf %51, %52 : vector<16x8x16xf32>
    %54 = arith.subf %50, %53 : vector<16x8x16xf32>
    %c32_i32_14 = arith.constant 32 : i32
    %55 = arith.addi %c32_i32_14, %30 : i32
    %56 = arith.index_cast %55 : i32 to index
    %c0_15 = arith.constant 0 : index
    %c0_16 = arith.constant 0 : index
    %57 = vector.load %arg4[%56, %c0_15, %c0_16] : memref<64x8x16xf32, #tpu.memory_space<vmem>>, vector<16x8x16xf32>
    tpu.vector_store %arg4[%56, %c0_15, %c0_16], %54 {strides = array<i32>} : memref<64x8x16xf32, #tpu.memory_space<vmem>>, vector<16x8x16xf32>,
    %c2_i32 = arith.constant 2 : i32
    return
  }
  func.func @transform_0(%arg0: i32, %arg1: i32) -> (i32, i32, i32) {
    %c0_i32 = arith.constant 0 : i32
    %c0_i32_0 = arith.constant 0 : i32
    %c0_i32_1 = arith.constant 0 : i32
    return %c0_i32, %c0_i32_0, %arg1 : i32, i32, i32
  }
  func.func @transform_1(%arg0: i32, %arg1: i32) -> (i32, i32, i32) {
    %c0_i32 = arith.constant 0 : i32
    %c0_i32_0 = arith.constant 0 : i32
    %c0_i32_1 = arith.constant 0 : i32
    return %c0_i32, %arg0, %c0_i32_0 : i32, i32, i32
  }
  func.func @transform_2(%arg0: i32, %arg1: i32) -> (i32, i32, i32) {
    %c0_i32 = arith.constant 0 : i32
    %c0_i32_0 = arith.constant 0 : i32
    return %c0_i32, %arg0, %arg1 : i32, i32, i32
  }
}

</mosaic_0001>

<bundles_post_ra>
// kernel: tpu_custom_call.1
= control target key start
LH: loop header
LB: loop body
LE: loop exit
PB: predicated region body
PF: predicated region fallthrough
CT: control target
= control target key end

     0   :  { %s1601_s9 = smov 0   ;;  %s1603_s10 = smov 0   ;;  %s2289_s0 = inlined_call_operand.vmem [shape: f32[32,2,16], index: 0, kind: input, shape index: {}]   ;;  %s2290_s1 = inlined_call_operand.vmem [shape: f32[32,16,2], index: 1, kind: input, shape index: {}]   ;;  %s2291_s2 = inlined_call_operand.vmem [shape: f32[64,16,16], index: 2, kind: output, shape index: {}]  }
   0x1   :  { %s1605_s11 = smov 0   ;;  %s1607_s12 = smov 0  }
   0x2   :  { %s1609_s13 = smov 0  }
   0x3 LB: > { %s24_s14 = sadd.s32 1, %s1578_s12  ;;  %s1398_s15 = sadd.s32 4294967295, %s1582_s13   ;;  %s1582_s13 = sphi %s1609_s13, %s12_s13   ;;  %s1578_s12 = sphi %s1607_s12, %s2296_s12   ;;  %s1574_s11 = sphi %s1605_s11, %s2295_s11   ;;  %s1570_s10 = sphi %s1603_s10, %s2294_s10   ;;  %s1566_s9 = sphi %s1601_s9, %s2293_s9  }
   0x4   : > { %p26_p0 = scmp.ge.s32.totalorder %s24_s14, 2  ;;  %p64_p1 = scmp.ne.s32.totalorder %s1570_s10, %s1566_s9 }
   0x5   : > { %p65_p2 = scmp.eq.s32.totalorder %s1582_s13, 0  ;;  %p96_p4 = scmp.eq.s32.totalorder %s1398_s15, 1 }
   0x6   : > { %s2298_s14 = smov (%p26_p0, %s24_s14), 0  ;;  %s57_s17 = sadd.s32 1, %s1570_s10 }
   0x7   : > { %p66_p3 = por %p65_p2, %p64_p1  ;;  %s54_s16 = ssub.s32 %s1578_s12, %s2298_s14 }
   0x8   : > { %p55_p5 = scmp.eq.s32.totalorder %s54_s16, 0  ;;  %p1636_p6 = por %p96_p4, %p64_p1 }
   0x9   : > { %p1402_p7 = scmp.ge.s32.totalorder %s1582_s13, 2 }
   0xa   : > { %s1641_s19 = scalar_select %p55_p5, %s1570_s10, %s57_s17  }
   0xb   : > { %125 = sbr.rel (%p1402_p7) target bundleno = 52 (0x34), region = 20 }
  0x10   : > { %128 = sbr.rel (!%p66_p3) target bundleno = 52 (0x34), region = 24  ;;  %s130_s20 = sand.u32 (%p66_p3), 1, %s1570_s10  }
  0x11   : > { %s1404_s21 = sshll.u32 (%p66_p3), %s1578_s12, 3  ;;  %s1403_s22 = sshll.u32 (%p66_p3), %s130_s20, 8 }
  0x12   : > { %s1649_s25 = scalar_lea.vmem (%p66_p3), %s2290_s1, %s1404_s21  ;;  %s1654_s26 = scalar_lea.vmem (%p66_p3), [#allocation2], %s1403_s22 }
  0x13   : > { %v225_v0 = vld [vmem:[%s1649_s25] sm:$0xff] (%p66_p3)  ;;  %v227_v1 = vld [vmem:[%s1649_s25 + $0x10] sm:$0xff] (%p66_p3) }
  0x14   : > { %v229_v2 = vld [vmem:[%s1649_s25 + $0x20] sm:$0xff] (%p66_p3)  ;;  %226 = vst [vmem:[%s1654_s26] sm:$0xff] (%p66_p3), %v225_v0  ;;  %v231_v3 = vld [vmem:[%s1649_s25 + $0x30] sm:$0xff] (%p66_p3) }
  0x15   : > { %228 = vst [vmem:[%s1654_s26 + $0x8] sm:$0xff] %v227_v1  ;;  %v233_v4 = vld [vmem:[%s1649_s25 + $0x40] sm:$0xff]  ;;  %v235_v5 = vld [vmem:[%s1649_s25 + $0x50] sm:$0xff] }
  0x16   : > { %230 = vst [vmem:[%s1654_s26 + $0x10] sm:$0xff] %v229_v2  ;;  %v237_v6 = vld [vmem:[%s1649_s25 + $0x60] sm:$0xff]  ;;  %v239_v7 = vld [vmem:[%s1649_s25 + $0x70] sm:$0xff] }
  0x17   : > { %232 = vst [vmem:[%s1654_s26 + $0x18] sm:$0xff] %v231_v3  ;;  %v241_v8 = vld [vmem:[%s1649_s25 + $0x80] sm:$0xff]  ;;  %v243_v9 = vld [vmem:[%s1649_s25 + $0x90] sm:$0xff] }
  0x18   : > { %234 = vst [vmem:[%s1654_s26 + $0x20] sm:$0xff] %v233_v4  ;;  %v245_v10 = vld [vmem:[%s1649_s25 + $0xa0] sm:$0xff]  ;;  %v247_v11 = vld [vmem:[%s1649_s25 + $0xb0] sm:$0xff] }
  0x19   : > { %236 = vst [vmem:[%s1654_s26 + $0x28] sm:$0xff] %v235_v5  ;;  %v249_v12 = vld [vmem:[%s1649_s25 + $0xc0] sm:$0xff]  ;;  %v251_v13 = vld [vmem:[%s1649_s25 + $0xd0] sm:$0xff] }
  0x1a   : > { %238 = vst [vmem:[%s1654_s26 + $0x30] sm:$0xff] %v237_v6  ;;  %v253_v14 = vld [vmem:[%s1649_s25 + $0xe0] sm:$0xff]  ;;  %v255_v15 = vld [vmem:[%s1649_s25 + $0xf0] sm:$0xff] }
  0x1b   : > { %240 = vst [vmem:[%s1654_s26 + $0x38] sm:$0xff] %v239_v7  ;;  %v257_v16 = vld [vmem:[%s1649_s25 + $0x100] sm:$0xff]  ;;  %v259_v17 = vld [vmem:[%s1649_s25 + $0x110] sm:$0xff] }
  0x1c   : > { %242 = vst [vmem:[%s1654_s26 + $0x40] sm:$0xff] %v241_v8  ;;  %v261_v18 = vld [vmem:[%s1649_s25 + $0x120] sm:$0xff]  ;;  %v263_v19 = vld [vmem:[%s1649_s25 + $0x130] sm:$0xff] }
  0x1d   : > { %244 = vst [vmem:[%s1654_s26 + $0x48] sm:$0xff] %v243_v9  ;;  %v265_v20 = vld [vmem:[%s1649_s25 + $0x140] sm:$0xff]  ;;  %v267_v21 = vld [vmem:[%s1649_s25 + $0x150] sm:$0xff] }
  0x1e   : > { %246 = vst [vmem:[%s1654_s26 + $0x50] sm:$0xff] %v245_v10  ;;  %v269_v22 = vld [vmem:[%s1649_s25 + $0x160] sm:$0xff]  ;;  %v271_v23 = vld [vmem:[%s1649_s25 + $0x170] sm:$0xff] }
  0x1f   : > { %248 = vst [vmem:[%s1654_s26 + $0x58] sm:$0xff] %v247_v11  ;;  %v273_v24 = vld [vmem:[%s1649_s25 + $0x180] sm:$0xff]  ;;  %v275_v25 = vld [vmem:[%s1649_s25 + $0x190] sm:$0xff] }
  0x20   : > { %250 = vst [vmem:[%s1654_s26 + $0x60] sm:$0xff] %v249_v12  ;;  %v277_v26 = vld [vmem:[%s1649_s25 + $0x1a0] sm:$0xff]  ;;  %v279_v27 = vld [vmem:[%s1649_s25 + $0x1b0] sm:$0xff] }
  0x21   : > { %252 = vst [vmem:[%s1654_s26 + $0x68] sm:$0xff] %v251_v13  ;;  %v281_v28 = vld [vmem:[%s1649_s25 + $0x1c0] sm:$0xff]  ;;  %v283_v29 = vld [vmem:[%s1649_s25 + $0x1d0] sm:$0xff] }
  0x22   : > { %254 = vst [vmem:[%s1654_s26 + $0x70] sm:$0xff] %v253_v14  ;;  %v285_v30 = vld [vmem:[%s1649_s25 + $0x1e0] sm:$0xff]  ;;  %v287_v31 = vld [vmem:[%s1649_s25 + $0x1f0] sm:$0xff] }
  0x23   : > { %256 = vst [vmem:[%s1654_s26 + $0x78] sm:$0xff] %v255_v15 }
  0x24   : > { %258 = vst [vmem:[%s1654_s26 + $0x80] sm:$0xff] %v257_v16 }
  0x25   : > { %260 = vst [vmem:[%s1654_s26 + $0x88] sm:$0xff] %v259_v17 }
  0x26   : > { %262 = vst [vmem:[%s1654_s26 + $0x90] sm:$0xff] %v261_v18 }
  0x27   : > { %264 = vst [vmem:[%s1654_s26 + $0x98] sm:$0xff] %v263_v19 }
  0x28   : > { %266 = vst [vmem:[%s1654_s26 + $0xa0] sm:$0xff] %v265_v20 }
  0x29   : > { %268 = vst [vmem:[%s1654_s26 + $0xa8] sm:$0xff] %v267_v21 }
  0x2a   : > { %270 = vst [vmem:[%s1654_s26 + $0xb0] sm:$0xff] %v269_v22 }
  0x2b   : > { %272 = vst [vmem:[%s1654_s26 + $0xb8] sm:$0xff] %v271_v23 }
  0x2c   : > { %274 = vst [vmem:[%s1654_s26 + $0xc0] sm:$0xff] %v273_v24 }
  0x2d   : > { %276 = vst [vmem:[%s1654_s26 + $0xc8] sm:$0xff] %v275_v25 }
  0x2e   : > { %278 = vst [vmem:[%s1654_s26 + $0xd0] sm:$0xff] %v277_v26 }
  0x2f   : > { %280 = vst [vmem:[%s1654_s26 + $0xd8] sm:$0xff] %v279_v27 }
  0x30   : > { %282 = vst [vmem:[%s1654_s26 + $0xe0] sm:$0xff] %v281_v28 }
  0x31   : > { %284 = vst [vmem:[%s1654_s26 + $0xe8] sm:$0xff] %v283_v29 }
  0x32   : > { %286 = vst [vmem:[%s1654_s26 + $0xf0] sm:$0xff] %v285_v30 }
  0x33   : > { %288 = vst [vmem:[%s1654_s26 + $0xf8] sm:$0xff] %v287_v31 }
  0x34 PF: > { %p1405_p8 = scmp.ge.s32.totalorder %s1582_s13, 1  ;;  %p293_p9 = scmp.lt.s32.totalorder %s1582_s13, 3 }
  0x36   : > { %p294_p10 = pnand %p1405_p8, %p293_p9 }
  0x37   : > { %s300_s27 = sand.u32 (!%p294_p10), 1, %s1566_s9  }
  0x38   : > { %297 = sbr.rel (%p294_p10) target bundleno = 403 (0x193), region = 62  ;;  %s1406_s28 = sshll.u32 (!%p294_p10), %s300_s27, 8 }
  0x39   : > { %s1725_s29 = scalar_lea.vmem (!%p294_p10), [#allocation2], %s1406_s28  ;;  %s1407_s4 = sshll.u32 (!%p294_p10), %s300_s27, 9 }
  0x3a   : > { %s1822_s7 = scalar_lea.vmem (!%p294_p10), [#allocation3], %s1407_s4 }
  0x3d   : > { %v1584_v32 = vmov 1   ;;  %v352_v33 = vld [vmem:[%s1725_s29 + $0x20] sm:$0xff]  ;;  %v350_v34 = vld [vmem:[%s1725_s29 + $0x10] sm:$0xff]  ;;  %v353_v36 = vld [vmem:[%s1725_s29 + $0x28] sm:$0xff]  ;;  %v1585_v49 = vmov 0   ;;  %vm589_vm0 = vcmask 130048  }
  0x3e   : > { %1536 = vset.pattern.permute.xlu2 %v1584_v32  ;;  %1535 = vset.pattern.permute.xlu1 %v1584_v32  ;;  %v348_v35 = vld [vmem:[%s1725_s29] sm:$0xff]  ;;  %v351_v37 = vld [vmem:[%s1725_s29 + $0x18] sm:$0xff]  ;;  %v349_v38 = vld [vmem:[%s1725_s29 + $0x8] sm:$0xff]  ;;  %s1489_s8 = sshll.u32 (%p1636_p6), %s1574_s11, 3 }
  0x3f   : > { %1534 = vset.pattern.permute.xlu0 %v1584_v32  ;;  %402 = vperm.xlu2 %1536, %v352_v33   ;;  %v356_v39 = vld [vmem:[%s1725_s29 + $0x40] sm:$0xff]  ;;  %v355_v40 = vld [vmem:[%s1725_s29 + $0x38] sm:$0xff]  ;;  %v354_v41 = vld [vmem:[%s1725_s29 + $0x30] sm:$0xff]  ;;  %s2146_s16 = scalar_lea.vmem (%p1636_p6), %s2291_s2, %s1489_s8 }
  0x40   : > { %392 = vperm.xlu1 %1535, %v350_v34   ;;  %382 = vperm.xlu0 %1534, %v348_v35   ;;  %v359_v42 = vld [vmem:[%s1725_s29 + $0x58] sm:$0xff]  ;;  %v358_v43 = vld [vmem:[%s1725_s29 + $0x50] sm:$0xff]  ;;  %v357_v44 = vld [vmem:[%s1725_s29 + $0x48] sm:$0xff] }
  0x41   : > { %v362_v45 = vld [vmem:[%s1725_s29 + $0x70] sm:$0xff]  ;;  %v361_v46 = vld [vmem:[%s1725_s29 + $0x68] sm:$0xff]  ;;  %v360_v47 = vld [vmem:[%s1725_s29 + $0x60] sm:$0xff] }
  0x42   : > { %v363_v48 = vld [vmem:[%s1725_s29 + $0x78] sm:$0xff]  ;;  %v1746_v50 = vld [vmem:[%s1725_s29 + $0x80] sm:$0xff]  ;;  %v1750_v51 = vld [vmem:[%s1725_s29 + $0xa8] sm:$0xff] }
  0x43   : > { %v1754_v52 = vld [vmem:[%s1725_s29 + $0xc0] sm:$0xff]  ;;  %v1758_v53 = vld [vmem:[%s1725_s29 + $0xd8] sm:$0xff]  ;;  %v1762_v54 = vld [vmem:[%s1725_s29 + $0xf0] sm:$0xff] }
  0x44   : > { %v1766_v55 = vld [vmem:[%s1725_s29 + $0x90] sm:$0xff]  ;;  %v1441_v56 = vld [vmem:[%s1725_s29 + $0x88] sm:$0xff]  ;;  %v1776_v58 = vld [vmem:[%s1725_s29 + $0xa0] sm:$0xff] }
  0x45   : > { %v1443_v59 = vld [vmem:[%s1725_s29 + $0x98] sm:$0xff]  ;;  %v1446_v62 = vld [vmem:[%s1725_s29 + $0xb0] sm:$0xff]  ;;  %v1449_v1 = vld [vmem:[%s1725_s29 + $0xc8] sm:$0xff] }
  0x46   : > { %v1783_v61 = vld [vmem:[%s1725_s29 + $0xb8] sm:$0xff]  ;;  %v1790_v0 = vld [vmem:[%s1725_s29 + $0xd0] sm:$0xff]  ;;  %v1801_v5 = vld [vmem:[%s1725_s29 + $0xe8] sm:$0xff] }
  0x47   : > { %407 = vperm.xlu2 %1536, %v353_v36   ;;  %v1452_v6 = vld [vmem:[%s1725_s29 + $0xe0] sm:$0xff]  ;;  %v1455_v13 = vld [vmem:[%s1725_s29 + $0xf8] sm:$0xff]  ;;  %v334_v20 = vld [vmem:[%s2289_s0 + $0x8] sm:$0x3] }
  0x48   : > { %397 = vperm.xlu1 %1535, %v351_v37   ;;  %387 = vperm.xlu0 %1534, %v349_v38   ;;  %v331_v9 = vld [vmem:[%s2289_s0 + $0x2] sm:$0x3]  ;;  %v368_v24 = vperm.slane %v334_v20, 0  ;;  %v480_v25 = vperm.slane %v334_v20, 1 }
  0x49   : > { %v365_v11 = vperm.slane %v331_v9, 0  ;;  %v477_v12 = vperm.slane %v331_v9, 1 }
  0x4f   : > { %422 = vperm.xlu2 %1536, %v356_v39  }
  0x50   : > { %417 = vperm.xlu1 %1535, %v355_v40   ;;  %412 = vperm.xlu0 %1534, %v354_v41  }
  0x57   : > { %437 = vperm.xlu2 %1536, %v359_v42  }
  0x58   : > { %432 = vperm.xlu1 %1535, %v358_v43   ;;  %427 = vperm.xlu0 %1534, %v357_v44  }
  0x5f   : > { %452 = vperm.xlu2 %1536, %v362_v45  }
  0x60   : > { %447 = vperm.xlu1 %1535, %v361_v46   ;;  %442 = vperm.xlu0 %1534, %v360_v47  }
  0x67   : > { %1538 = vset.pattern.permute.xlu2 %v1585_v49 }
  0x68   : > { %1537 = vset.pattern.permute.xlu1 %v1585_v49  ;;  %457 = vperm.xlu0 %1534, %v363_v48  }
  0x69   : > { %497 = vperm.xlu2 %1538, %v349_v38   ;;  %493 = vperm.xlu1 %1537, %v348_v35  }
  0x70   : > { %727 = vperm.xlu0 %1534, %v1746_v50  }
  0x71   : > { %509 = vperm.xlu2 %1538, %v352_v33   ;;  %505 = vperm.xlu1 %1537, %v351_v37  }
  0x78   : > { %752 = vperm.xlu0 %1534, %v1750_v51  }
  0x79   : > { %517 = vperm.xlu2 %1538, %v354_v41   ;;  %513 = vperm.xlu1 %1537, %v353_v36  }
  0x80   : > { %767 = vperm.xlu0 %1534, %v1754_v52  }
  0x81   : > { %529 = vperm.xlu2 %1538, %v357_v44   ;;  %525 = vperm.xlu1 %1537, %v356_v39  }
  0x88   : > { %782 = vperm.xlu0 %1534, %v1758_v53  }
  0x89   : > { %541 = vperm.xlu2 %1538, %v360_v47   ;;  %537 = vperm.xlu1 %1537, %v359_v42  }
  0x90   : > { %797 = vperm.xlu0 %1534, %v1762_v54  }
  0x91   : > { %553 = vperm.xlu2 %1538, %v363_v48   ;;  %549 = vperm.xlu1 %1537, %v362_v45   ;;  %v339_v45 = vld [vmem:[%s2289_s0 + $0x12] sm:$0x3] }
  0x98   : > { %1541 = vset.pattern.permute.xlu0 %v1585_v49 }
  0x99   : > { %1540 = vset.pattern.permute.xlu2 %v1584_v32  ;;  %1539 = vset.pattern.permute.xlu1 %v1584_v32  ;;  %v1772_v57 = vpop.permute.xlu2 %402  ;;  %v336_v32 = vld [vmem:[%s2289_s0 + $0xc] sm:$0x3] }
  0x9a   : > { %501 = vperm.xlu0 %1541, %v350_v34   ;;  %737 = vperm.xlu2 %1540, %v1766_v55   ;;  %v464_v29 = vmul.f32 %v1772_v57, %v368_v24  ;;  %v610_v31 = vmul.f32 %v480_v25, %v1772_v57  ;;  %v370_v36 = vperm.slane %v336_v32, 0  ;;  %v482_v37 = vperm.slane %v336_v32, 1 }
  0x9b   : > { %732 = vperm.xlu1 %1539, %v1441_v56  }
  0xa1   : > { %v1779_v60 = vpop.permute.xlu2 %407 }
  0xa2   : > { %521 = vperm.xlu0 %1541, %v355_v40   ;;  %747 = vperm.xlu2 %1540, %v1776_v58  }
  0xa3   : > { %742 = vperm.xlu1 %1539, %v1443_v59  }
  0xa9   : > { %v1786_v63 = vpop.permute.xlu2 %422 }
  0xaa   : > { %533 = vperm.xlu0 %1541, %v358_v43   ;;  %762 = vperm.xlu2 %1540, %v1783_v61  }
  0xab   : > { %757 = vperm.xlu1 %1539, %v1446_v62  }
  0xb1   : > { %v1793_v2 = vpop.permute.xlu2 %437 }
  0xb2   : > { %545 = vperm.xlu0 %1541, %v361_v46   ;;  %v1795_v3 = vpop.permute.xlu1 %392  ;;  %777 = vperm.xlu2 %1540, %v1790_v0   ;;  %v1798_v4 = vpop.permute.xlu0 %382  ;;  %v330_v46 = vld [vmem:[%s2289_s0] sm:$0x3] }
  0xb3   : > { %772 = vperm.xlu1 %1539, %v1449_v1  }
  0xb9   : > { %v1804_v7 = vpop.permute.xlu2 %452 }
  0xba   : > { %842 = vperm.xlu0 %1541, %v1441_v56   ;;  %v1806_v8 = vpop.permute.xlu1 %397  ;;  %792 = vperm.xlu2 %1540, %v1801_v5   ;;  %v388_v10 = vpop.permute.xlu0 %387 }
  0xbb   : > { %787 = vperm.xlu1 %1539, %v1452_v6   ;;  %v461_v14 = vmul.f32 %v388_v10, %v365_v11  ;;  %v607_v16 = vmul.f32 %v477_v12, %v388_v10 }
  0xc2   : > { %862 = vperm.xlu0 %1541, %v1446_v62   ;;  %v1815_v15 = vpop.permute.xlu1 %417  ;;  %1542 = vset.pattern.permute.xlu2 %v1585_v49  ;;  %v413_v17 = vpop.permute.xlu0 %412 }
  0xc3   : > { %v498_v18 = vpop.permute.xlu2 %497  ;;  %802 = vperm.xlu1 %1539, %v1455_v13   ;;  %838 = vperm.xlu2 %1542, %v1746_v50   ;;  %v466_v41 = vmul.f32 %v413_v17, %v370_v36  ;;  %v612_v42 = vmul.f32 %v482_v37, %v413_v17  ;;  %v485_v50 = vperm.slane %v339_v45, 1 }
  0xc4   : > { %v557_v19 = vmul.f32 %v498_v18, %v477_v12  ;;  %v623_v21 = vmul.f32 %v498_v18, %v365_v11  ;;  %v342_v11 = vld [vmem:[%s2289_s0 + $0x18] sm:$0x3] }
  0xc6   : > { %v573_v22 = vadd.f32 %v557_v19, %v461_v14  ;;  %v639_v23 = vsub.f32 %v607_v16, %v623_v21  ;;  %v376_v19 = vperm.slane %v342_v11, 0 }
  0xc8   : > { %591 = vst.msk [vmem:[%s1822_s7 + $0x8] sm:$0xff] %vm589_vm0, %v573_v22 }
  0xc9   : > { %1409 = vst.msk [vmem:[%s1822_s7 + $0x108] sm:$0xff] %vm589_vm0, %v639_v23 }
  0xca   : > { %874 = vperm.xlu0 %1541, %v1449_v1   ;;  %v1828_v26 = vpop.permute.xlu1 %432  ;;  %v428_v27 = vpop.permute.xlu0 %427 }
  0xcb   : > { %v510_v28 = vpop.permute.xlu2 %509  ;;  %1543 = vset.pattern.permute.xlu1 %v1585_v49  ;;  %850 = vperm.xlu2 %1542, %v1443_v59   ;;  %v373_v49 = vperm.slane %v339_v45, 0  ;;  %v615_v62 = vmul.f32 %v485_v50, %v428_v27 }
  0xcc   : > { %v560_v30 = vmul.f32 %v510_v28, %v480_v25  ;;  %v626_v33 = vmul.f32 %v510_v28, %v368_v24  ;;  %846 = vperm.xlu1 %1543, %v1766_v55   ;;  %v364_v55 = vperm.slane %v330_v46, 0 }
  0xcd   : > { %v469_v59 = vmul.f32 %v428_v27, %v373_v49 }
  0xce   : > { %v576_v34 = vadd.f32 %v560_v30, %v464_v29  ;;  %v642_v35 = vsub.f32 %v610_v31, %v626_v33  ;;  %v460_v9 = vmul.f32 %v1798_v4, %v364_v55  ;;  %v345_v31 = vld [vmem:[%s2289_s0 + $0x1e] sm:$0x3] }
  0xd0   : > { %594 = vst.msk [vmem:[%s1822_s7 + $0x20] sm:$0xff] %vm589_vm0, %v576_v34 }
  0xd1   : > { %1412 = vst.msk [vmem:[%s1822_s7 + $0x120] sm:$0xff] %vm589_vm0, %v642_v35 }
  0xd2   : > { %886 = vperm.xlu0 %1541, %v1452_v6   ;;  %v1841_v38 = vpop.permute.xlu1 %447  ;;  %v443_v39 = vpop.permute.xlu0 %442 }
  0xd3   : > { %v518_v40 = vpop.permute.xlu2 %517  ;;  %858 = vperm.xlu2 %1542, %v1750_v51   ;;  %v476_v51 = vperm.slane %v330_v46, 1  ;;  %v472_v23 = vmul.f32 %v443_v39, %v376_v19 }
  0xd4   : > { %v562_v43 = vmul.f32 %v518_v40, %v482_v37  ;;  %v628_v44 = vmul.f32 %v518_v40, %v370_v36  ;;  %854 = vperm.xlu1 %1543, %v1776_v58  }
  0xd5   : > { %v606_v10 = vmul.f32 %v476_v51, %v1798_v4  ;;  %v488_v4 = vperm.slane %v342_v11, 1 }
  0xd6   : > { %v578_v47 = vadd.f32 %v562_v43, %v466_v41  ;;  %v644_v48 = vsub.f32 %v612_v42, %v628_v44 }
  0xd7   : > { %v618_v24 = vmul.f32 %v488_v4, %v443_v39  ;;  %v379_v39 = vperm.slane %v345_v31, 0 }
  0xd8   : > { %596 = vst.msk [vmem:[%s1822_s7 + $0x30] sm:$0xff] %vm589_vm0, %v578_v47 }
  0xd9   : > { %1414 = vst.msk [vmem:[%s1822_s7 + $0x130] sm:$0xff] %vm589_vm0, %v644_v48 }
  0xda   : > { %898 = vperm.xlu0 %1541, %v1455_v13   ;;  %v458_v56 = vpop.permute.xlu0 %457 }
  0xdb   : > { %v530_v57 = vpop.permute.xlu2 %529  ;;  %870 = vperm.xlu2 %1542, %v1754_v52   ;;  %v494_v6 = vpop.permute.xlu1 %493  ;;  %v333_v52 = vld [vmem:[%s2289_s0 + $0x6] sm:$0x3]  ;;  %v475_v43 = vmul.f32 %v458_v56, %v379_v39 }
  0xdc   : > { %v565_v58 = vmul.f32 %v530_v57, %v485_v50  ;;  %v631_v1 = vmul.f32 %v530_v57, %v373_v49  ;;  %866 = vperm.xlu1 %1543, %v1783_v61   ;;  %v556_v12 = vmul.f32 %v494_v6, %v476_v51  ;;  %v622_v13 = vmul.f32 %v494_v6, %v364_v55  ;;  %v338_v51 = vld [vmem:[%s2289_s0 + $0x10] sm:$0x3] }
  0xdd   : > { %v367_v20 = vperm.slane %v333_v52, 0  ;;  %v479_v21 = vperm.slane %v333_v52, 1 }
  0xde   : > { %v581_v14 = vadd.f32 %v565_v58, %v469_v59  ;;  %v647_v16 = vsub.f32 %v615_v62, %v631_v1  ;;  %v572_v17 = vadd.f32 %v556_v12, %v460_v9  ;;  %v638_v18 = vsub.f32 %v606_v10, %v622_v13  ;;  %v341_v12 = vld [vmem:[%s2289_s0 + $0x16] sm:$0x3] }
  0xdf   : > { %v463_v29 = vmul.f32 %v1806_v8, %v367_v20  ;;  %v609_v30 = vmul.f32 %v479_v21, %v1806_v8  ;;  %v491_v8 = vperm.slane %v345_v31, 1  ;;  %v372_v62 = vperm.slane %v338_v51, 0 }
  0xe0   : > { %599 = vst.msk [vmem:[%s1822_s7 + $0x48] sm:$0xff] %vm589_vm0, %v581_v14  ;;  %v484_v58 = vperm.slane %v338_v51, 1  ;;  %v375_v14 = vperm.slane %v341_v12, 0 }
  0xe1   : > { %1417 = vst.msk [vmem:[%s1822_s7 + $0x148] sm:$0xff] %vm589_vm0, %v647_v16  ;;  %v621_v44 = vmul.f32 %v491_v8, %v458_v56  ;;  %v468_v1 = vmul.f32 %v1786_v63, %v372_v62  ;;  %v487_v16 = vperm.slane %v341_v12, 1 }
  0xe2   : > { %590 = vst.msk [vmem:[%s1822_s7] sm:$0xff] %vm589_vm0, %v572_v17  ;;  %v1873_v61 = vpop.permute.xlu0 %727  ;;  %v614_v6 = vmul.f32 %v484_v58, %v1786_v63 }
  0xe3   : > { %1408 = vst.msk [vmem:[%s1822_s7 + $0x100] sm:$0xff] %vm589_vm0, %v638_v18  ;;  %v542_v22 = vpop.permute.xlu2 %541  ;;  %882 = vperm.xlu2 %1542, %v1758_v53   ;;  %v506_v28 = vpop.permute.xlu1 %505  ;;  %v335_v53 = vld [vmem:[%s2289_s0 + $0xa] sm:$0x3]  ;;  %v471_v18 = vmul.f32 %v1793_v2, %v375_v14 }
  0xe4   : > { %v568_v25 = vmul.f32 %v542_v22, %v488_v4  ;;  %v634_v27 = vmul.f32 %v542_v22, %v376_v19  ;;  %878 = vperm.xlu1 %1543, %v1790_v0   ;;  %v559_v32 = vmul.f32 %v506_v28, %v479_v21  ;;  %v625_v33 = vmul.f32 %v506_v28, %v367_v20  ;;  %v344_v22 = vld [vmem:[%s2289_s0 + $0x1c] sm:$0x3] }
  0xe5   : > { %v369_v40 = vperm.slane %v335_v53, 0  ;;  %v481_v41 = vperm.slane %v335_v53, 1  ;;  %v617_v19 = vmul.f32 %v487_v16, %v1793_v2  ;;  %v332_v53 = vld [vmem:[%s2289_s0 + $0x4] sm:$0x3] }
  0xe6   : > { %v584_v34 = vadd.f32 %v568_v25, %v472_v23  ;;  %v650_v35 = vsub.f32 %v618_v24, %v634_v27  ;;  %v575_v36 = vadd.f32 %v559_v32, %v463_v29  ;;  %v641_v37 = vsub.f32 %v609_v30, %v625_v33 }
  0xe7   : > { %v465_v48 = vmul.f32 %v1779_v60, %v369_v40  ;;  %v611_v49 = vmul.f32 %v481_v41, %v1779_v60  ;;  %v378_v25 = vperm.slane %v344_v22, 0  ;;  %v490_v27 = vperm.slane %v344_v22, 1 }
  0xe8   : > { %602 = vst.msk [vmem:[%s1822_s7 + $0x60] sm:$0xff] %vm589_vm0, %v584_v34 }
  0xe9   : > { %1420 = vst.msk [vmem:[%s1822_s7 + $0x160] sm:$0xff] %vm589_vm0, %v650_v35  ;;  %v474_v29 = vmul.f32 %v1804_v7, %v378_v25  ;;  %v620_v30 = vmul.f32 %v490_v27, %v1804_v7 }
  0xea   : > { %593 = vst.msk [vmem:[%s1822_s7 + $0x18] sm:$0xff] %vm589_vm0, %v575_v36  ;;  %v1893_v0 = vpop.permute.xlu0 %752  ;;  %v366_v36 = vperm.slane %v332_v53, 0 }
  0xeb   : > { %1411 = vst.msk [vmem:[%s1822_s7 + $0x118] sm:$0xff] %vm589_vm0, %v641_v37  ;;  %v554_v42 = vpop.permute.xlu2 %553  ;;  %894 = vperm.xlu2 %1542, %v1762_v54   ;;  %v514_v47 = vpop.permute.xlu1 %513  ;;  %v478_v37 = vperm.slane %v332_v53, 1 }
  0xec   : > { %v571_v45 = vmul.f32 %v554_v42, %v491_v8  ;;  %v637_v46 = vmul.f32 %v554_v42, %v379_v39  ;;  %890 = vperm.xlu1 %1543, %v1801_v5   ;;  %v561_v50 = vmul.f32 %v514_v47, %v481_v41  ;;  %v627_v55 = vmul.f32 %v514_v47, %v369_v40 }
  0xed   : > { %v462_v7 = vmul.f32 %v1795_v3, %v366_v36  ;;  %v608_v8 = vmul.f32 %v478_v37, %v1795_v3 }
  0xee   : > { %v587_v56 = vadd.f32 %v571_v45, %v475_v43  ;;  %v653_v54 = vsub.f32 %v621_v44, %v637_v46  ;;  %v577_v57 = vadd.f32 %v561_v50, %v465_v48  ;;  %v643_v59 = vsub.f32 %v611_v49, %v627_v55  ;;  %v337_v44 = vld [vmem:[%s2289_s0 + $0xe] sm:$0x3] }
  0xef   : > { %v371_v47 = vperm.slane %v337_v44, 0  ;;  %v483_v48 = vperm.slane %v337_v44, 1 }
  0xf0   : > { %605 = vst.msk [vmem:[%s1822_s7 + $0x78] sm:$0xff] %vm589_vm0, %v587_v56 }
  0xf1   : > { %1423 = vst.msk [vmem:[%s1822_s7 + $0x178] sm:$0xff] %vm589_vm0, %v653_v54  ;;  %v467_v49 = vmul.f32 %v1815_v15, %v371_v47  ;;  %v613_v50 = vmul.f32 %v483_v48, %v1815_v15 }
  0xf2   : > { %595 = vst.msk [vmem:[%s1822_s7 + $0x28] sm:$0xff] %vm589_vm0, %v577_v57  ;;  %v1910_v60 = vpop.permute.xlu0 %767  ;;  %v340_v57 = vld [vmem:[%s2289_s0 + $0x14] sm:$0x3] }
  0xf3   : > { %1413 = vst.msk [vmem:[%s1822_s7 + $0x128] sm:$0xff] %vm589_vm0, %v643_v59  ;;  %v526_v5 = vpop.permute.xlu1 %525  ;;  %v1424_v59 = vld [vmem:[%s2289_s0 + $0x20] sm:$0x3] }
  0xf4   : > { %v564_v9 = vmul.f32 %v526_v5, %v484_v58  ;;  %v630_v10 = vmul.f32 %v526_v5, %v372_v62  ;;  %v1914_v11 = vpop.permute.xlu2 %737  ;;  %v374_v5 = vperm.slane %v340_v57, 0  ;;  %v709_v15 = vperm.slane %v1424_v59, 0 }
  0xf6   : > { %v580_v13 = vadd.f32 %v564_v9, %v468_v1  ;;  %v646_v52 = vsub.f32 %v614_v6, %v630_v10  ;;  %v486_v1 = vperm.slane %v340_v57, 1  ;;  %v821_v6 = vperm.slane %v1424_v59, 1  ;;  %v1430_v59 = vld [vmem:[%s2289_s0 + $0x2c] sm:$0x3] }
  0xf7   : > { %v470_v10 = vmul.f32 %v1828_v26, %v374_v5 }
  0xf8   : > { %598 = vst.msk [vmem:[%s1822_s7 + $0x40] sm:$0xff] %vm589_vm0, %v580_v13  ;;  %v616_v12 = vmul.f32 %v486_v1, %v1828_v26 }
  0xf9   : > { %1416 = vst.msk [vmem:[%s1822_s7 + $0x140] sm:$0xff] %vm589_vm0, %v646_v52 }
  0xfa   : > { %v1923_v17 = vpop.permute.xlu0 %782 }
  0xfb   : > { %v538_v63 = vpop.permute.xlu1 %537 }
  0xfc   : > { %v567_v4 = vmul.f32 %v538_v63, %v487_v16  ;;  %v633_v20 = vmul.f32 %v538_v63, %v375_v14  ;;  %v1927_v21 = vpop.permute.xlu2 %747  ;;  %v343_v16 = vld [vmem:[%s2289_s0 + $0x1a] sm:$0x3]  ;;  %v805_v63 = vmul.f32 %v1873_v61, %v709_v15 }
  0xfe   : > { %v583_v23 = vadd.f32 %v567_v4, %v471_v18  ;;  %v649_v24 = vsub.f32 %v617_v19, %v633_v20  ;;  %v950_v18 = vmul.f32 %v821_v6, %v1873_v61 }
 0x100   : > { %601 = vst.msk [vmem:[%s1822_s7 + $0x58] sm:$0xff] %vm589_vm0, %v583_v23  ;;  %v377_v23 = vperm.slane %v343_v16, 0 }
 0x101   : > { %1419 = vst.msk [vmem:[%s1822_s7 + $0x158] sm:$0xff] %vm589_vm0, %v649_v24  ;;  %v489_v24 = vperm.slane %v343_v16, 1 }
 0x102   : > { %v1936_v28 = vpop.permute.xlu0 %797 }
 0x103   : > { %v550_v2 = vpop.permute.xlu1 %549 }
 0x104   : > { %v570_v31 = vmul.f32 %v550_v2, %v490_v27  ;;  %v636_v32 = vmul.f32 %v550_v2, %v378_v25  ;;  %v1940_v33 = vpop.permute.xlu2 %762  ;;  %v1427_v25 = vld [vmem:[%s2289_s0 + $0x26] sm:$0x3] }
 0x105   : > { %v712_v61 = vperm.slane %v1427_v25, 0 }
 0x106   : > { %v586_v34 = vadd.f32 %v570_v31, %v474_v29  ;;  %v652_v35 = vsub.f32 %v620_v30, %v636_v32  ;;  %v824_v29 = vperm.slane %v1427_v25, 1  ;;  %v473_v31 = vmul.f32 %v1841_v38, %v377_v23  ;;  %v1435_v25 = vld [vmem:[%s2289_s0 + $0x36] sm:$0x3] }
 0x107   : > { %v619_v32 = vmul.f32 %v489_v24, %v1841_v38  ;;  %v1429_v38 = vld [vmem:[%s2289_s0 + $0x2a] sm:$0x3] }
 0x108   : > { %604 = vst.msk [vmem:[%s1822_s7 + $0x70] sm:$0xff] %vm589_vm0, %v586_v34 }
 0x109   : > { %1422 = vst.msk [vmem:[%s1822_s7 + $0x170] sm:$0xff] %vm589_vm0, %v652_v35  ;;  %v1425_v35 = vld [vmem:[%s2289_s0 + $0x22] sm:$0x3] }
 0x10c   : > { %v502_v39 = vpop.permute.xlu0 %501  ;;  %v1951_v42 = vpop.permute.xlu2 %777 }
 0x10d   : > { %v558_v40 = vmul.f32 %v502_v39, %v478_v37  ;;  %v624_v41 = vmul.f32 %v502_v39, %v366_v36  ;;  %v1953_v43 = vpop.permute.xlu1 %732 }
 0x10f   : > { %v574_v45 = vadd.f32 %v558_v40, %v462_v7  ;;  %v640_v46 = vsub.f32 %v608_v8, %v624_v41 }
 0x111   : > { %592 = vst.msk [vmem:[%s1822_s7 + $0x10] sm:$0xff] %vm589_vm0, %v574_v45  ;;  %v710_v45 = vperm.slane %v1425_v35, 0 }
 0x112   : > { %1410 = vst.msk [vmem:[%s1822_s7 + $0x110] sm:$0xff] %vm589_vm0, %v640_v46  ;;  %v822_v46 = vperm.slane %v1425_v35, 1  ;;  %v832_v35 = vperm.slane %v1435_v25, 1 }
 0x114   : > { %v522_v3 = vpop.permute.xlu0 %521  ;;  %v1964_v56 = vpop.permute.xlu2 %792 }
 0x115   : > { %v563_v55 = vmul.f32 %v522_v3, %v483_v48  ;;  %v629_v51 = vmul.f32 %v522_v3, %v371_v47  ;;  %v743_v54 = vpop.permute.xlu1 %742  ;;  %v714_v3 = vperm.slane %v1429_v38, 0 }
 0x116   : > { %v808_v8 = vmul.f32 %v743_v54, %v712_v61  ;;  %v953_v40 = vmul.f32 %v824_v29, %v743_v54 }
 0x117   : > { %v579_v62 = vadd.f32 %v563_v55, %v467_v49  ;;  %v645_v58 = vsub.f32 %v613_v50, %v629_v51  ;;  %v826_v49 = vperm.slane %v1429_v38, 1  ;;  %v806_v55 = vmul.f32 %v1953_v43, %v710_v45 }
 0x118   : > { %v951_v51 = vmul.f32 %v822_v46, %v1953_v43 }
 0x119   : > { %597 = vst.msk [vmem:[%s1822_s7 + $0x38] sm:$0xff] %vm589_vm0, %v579_v62  ;;  %v955_v43 = vmul.f32 %v826_v49, %v1893_v0 }
 0x11a   : > { %1415 = vst.msk [vmem:[%s1822_s7 + $0x138] sm:$0xff] %vm589_vm0, %v645_v58 }
 0x11c   : > { %v534_v9 = vpop.permute.xlu0 %533 }
 0x11d   : > { %v566_v13 = vmul.f32 %v534_v9, %v486_v1  ;;  %v632_v52 = vmul.f32 %v534_v9, %v374_v5  ;;  %v1978_v14 = vpop.permute.xlu1 %757  ;;  %v839_v19 = vpop.permute.xlu2 %838 }
 0x11e   : > { %v901_v22 = vmul.f32 %v839_v19, %v821_v6  ;;  %v966_v26 = vmul.f32 %v839_v19, %v709_v15  ;;  %v810_v15 = vmul.f32 %v1893_v0, %v714_v3 }
 0x11f   : > { %v582_v4 = vadd.f32 %v566_v13, %v470_v10  ;;  %v648_v20 = vsub.f32 %v616_v12, %v632_v52  ;;  %v1432_v10 = vld [vmem:[%s2289_s0 + $0x30] sm:$0x3]  ;;  %v715_v12 = vperm.slane %v1430_v59, 0  ;;  %v827_v13 = vperm.slane %v1430_v59, 1 }
 0x120   : > { %v917_v27 = vadd.f32 %v901_v22, %v805_v63  ;;  %v982_v2 = vsub.f32 %v950_v18, %v966_v26  ;;  %v717_v63 = vperm.slane %v1432_v10, 0  ;;  %v829_v18 = vperm.slane %v1432_v10, 1  ;;  %v1433_v26 = vld [vmem:[%s2289_s0 + $0x32] sm:$0x3] }
 0x121   : > { %600 = vst.msk [vmem:[%s1822_s7 + $0x50] sm:$0xff] %vm589_vm0, %v582_v4  ;;  %v811_v19 = vmul.f32 %v1978_v14, %v715_v12  ;;  %v956_v4 = vmul.f32 %v827_v13, %v1978_v14 }
 0x122   : > { %1418 = vst.msk [vmem:[%s1822_s7 + $0x150] sm:$0xff] %vm589_vm0, %v648_v20  ;;  %v813_v14 = vmul.f32 %v1910_v60, %v717_v63 }
 0x123   : > { %1456 = vst.msk [vmem:[%s1822_s7 + $0x80] sm:$0xff] %vm589_vm0, %v917_v27 }
 0x124   : > { %1472 = vst.msk [vmem:[%s1822_s7 + $0x180] sm:$0xff] %vm589_vm0, %v982_v2  ;;  %v546_v30 = vpop.permute.xlu0 %545 }
 0x125   : > { %v569_v53 = vmul.f32 %v546_v30, %v489_v24  ;;  %v635_v34 = vmul.f32 %v546_v30, %v377_v23  ;;  %v2001_v36 = vpop.permute.xlu1 %772  ;;  %v851_v37 = vpop.permute.xlu2 %850 }
 0x126   : > { %v904_v41 = vmul.f32 %v851_v37, %v824_v29  ;;  %v969_v44 = vmul.f32 %v851_v37, %v712_v61  ;;  %v958_v61 = vmul.f32 %v829_v18, %v1910_v60 }
 0x127   : > { %v585_v39 = vadd.f32 %v569_v53, %v473_v31  ;;  %v651_v7 = vsub.f32 %v619_v32, %v635_v34  ;;  %v1426_v31 = vld [vmem:[%s2289_s0 + $0x24] sm:$0x3]  ;;  %v718_v32 = vperm.slane %v1433_v26, 0  ;;  %v830_v53 = vperm.slane %v1433_v26, 1 }
 0x128   : > { %v920_v47 = vadd.f32 %v904_v41, %v808_v8  ;;  %v985_v48 = vsub.f32 %v953_v40, %v969_v44  ;;  %v720_v34 = vperm.slane %v1435_v25, 0  ;;  %v823_v8 = vperm.slane %v1426_v31, 1 }
 0x129   : > { %603 = vst.msk [vmem:[%s1822_s7 + $0x68] sm:$0xff] %vm589_vm0, %v585_v39  ;;  %v814_v40 = vmul.f32 %v2001_v36, %v718_v32  ;;  %v959_v41 = vmul.f32 %v830_v53, %v2001_v36 }
 0x12a   : > { %1421 = vst.msk [vmem:[%s1822_s7 + $0x168] sm:$0xff] %vm589_vm0, %v651_v7  ;;  %v711_v7 = vperm.slane %v1426_v31, 0 }
 0x12b   : > { %1459 = vst.msk [vmem:[%s1822_s7 + $0x98] sm:$0xff] %vm589_vm0, %v920_v47  ;;  %v1436_v47 = vld [vmem:[%s2289_s0 + $0x38] sm:$0x3] }
 0x12c   : > { %v843_v50 = vpop.permute.xlu0 %842  ;;  %1475 = vst.msk [vmem:[%s1822_s7 + $0x198] sm:$0xff] %vm589_vm0, %v985_v48 }
 0x12d   : > { %v902_v54 = vmul.f32 %v843_v50, %v822_v46  ;;  %v967_v57 = vmul.f32 %v843_v50, %v710_v45  ;;  %v2019_v62 = vpop.permute.xlu1 %787  ;;  %v859_v58 = vpop.permute.xlu2 %858  ;;  %v816_v45 = vmul.f32 %v1923_v17, %v720_v34  ;;  %v961_v46 = vmul.f32 %v832_v35, %v1923_v17 }
 0x12e   : > { %v906_v6 = vmul.f32 %v859_v58, %v826_v49  ;;  %v971_v9 = vmul.f32 %v859_v58, %v714_v3  ;;  %v1438_v3 = vld [vmem:[%s2289_s0 + $0x3c] sm:$0x3]  ;;  %v952_v17 = vmul.f32 %v823_v8, %v1914_v11  ;;  %v1428_v58 = vld [vmem:[%s2289_s0 + $0x28] sm:$0x3] }
 0x12f   : > { %v918_v5 = vadd.f32 %v902_v54, %v806_v55  ;;  %v983_v1 = vsub.f32 %v951_v51, %v967_v57  ;;  %v807_v54 = vmul.f32 %v1914_v11, %v711_v7 }
 0x130   : > { %v922_v52 = vadd.f32 %v906_v6, %v810_v15  ;;  %v987_v16 = vsub.f32 %v955_v43, %v971_v9  ;;  %v723_v6 = vperm.slane %v1438_v3, 0  ;;  %v835_v9 = vperm.slane %v1438_v3, 1 }
 0x131   : > { %1457 = vst.msk [vmem:[%s1822_s7 + $0x88] sm:$0xff] %vm589_vm0, %v918_v5  ;;  %v721_v5 = vperm.slane %v1436_v47, 0 }
 0x132   : > { %1473 = vst.msk [vmem:[%s1822_s7 + $0x188] sm:$0xff] %vm589_vm0, %v983_v1  ;;  %v833_v1 = vperm.slane %v1436_v47, 1 }
 0x133   : > { %1461 = vst.msk [vmem:[%s1822_s7 + $0xa8] sm:$0xff] %vm589_vm0, %v922_v52 }
 0x134   : > { %v863_v0 = vpop.permute.xlu0 %862  ;;  %1477 = vst.msk [vmem:[%s1822_s7 + $0x1a8] sm:$0xff] %vm589_vm0, %v987_v16  ;;  %v817_v16 = vmul.f32 %v2019_v62, %v721_v5 }
 0x135   : > { %v907_v20 = vmul.f32 %v863_v0, %v827_v13  ;;  %v972_v22 = vmul.f32 %v863_v0, %v715_v12  ;;  %v2039_v23 = vpop.permute.xlu1 %802  ;;  %v871_v24 = vpop.permute.xlu2 %870  ;;  %v713_v12 = vperm.slane %v1428_v58, 0  ;;  %v825_v13 = vperm.slane %v1428_v58, 1 }
 0x136   : > { %v909_v29 = vmul.f32 %v871_v24, %v829_v18  ;;  %v974_v30 = vmul.f32 %v871_v24, %v717_v63  ;;  %v962_v63 = vmul.f32 %v833_v1, %v2019_v62 }
 0x137   : > { %v923_v27 = vadd.f32 %v907_v20, %v811_v19  ;;  %v988_v2 = vsub.f32 %v956_v4, %v972_v22  ;;  %v819_v19 = vmul.f32 %v1936_v28, %v723_v6  ;;  %v964_v4 = vmul.f32 %v835_v9, %v1936_v28  ;;  %v1439_v20 = vld [vmem:[%s2289_s0 + $0x3e] sm:$0x3] }
 0x138   : > { %v925_v37 = vadd.f32 %v909_v29, %v813_v14  ;;  %v990_v39 = vsub.f32 %v958_v61, %v974_v30  ;;  %v954_v28 = vmul.f32 %v825_v13, %v1927_v21  ;;  %v1431_v29 = vld [vmem:[%s2289_s0 + $0x2e] sm:$0x3]  ;;  %v724_v30 = vperm.slane %v1439_v20, 0 }
 0x139   : > { %1462 = vst.msk [vmem:[%s1822_s7 + $0xb0] sm:$0xff] %vm589_vm0, %v923_v27  ;;  %v836_v31 = vperm.slane %v1439_v20, 1  ;;  %v1201_v20 = vld [vmem:[%s1822_s7 + $0x50] sm:$0xff] (%p1636_p6) }
 0x13a   : > { %1478 = vst.msk [vmem:[%s1822_s7 + $0x1b0] sm:$0xff] %vm589_vm0, %v988_v2  ;;  %v809_v2 = vmul.f32 %v1927_v21, %v713_v12  ;;  %v716_v21 = vperm.slane %v1431_v29, 0 }
 0x13b   : > { %1464 = vst.msk [vmem:[%s1822_s7 + $0xc0] sm:$0xff] %vm589_vm0, %v925_v37  ;;  %v828_v37 = vperm.slane %v1431_v29, 1  ;;  %v1223_v29 = vld [vmem:[%s1822_s7 + $0xa8] sm:$0xff] (%p1636_p6) }
 0x13c   : > { %v875_v60 = vpop.permute.xlu0 %874  ;;  %1480 = vst.msk [vmem:[%s1822_s7 + $0x1c0] sm:$0xff] %vm589_vm0, %v990_v39 }
 0x13d   : > { %v910_v44 = vmul.f32 %v875_v60, %v830_v53  ;;  %v975_v38 = vmul.f32 %v875_v60, %v718_v32  ;;  %v883_v48 = vpop.permute.xlu2 %882  ;;  %1202 = vst [vmem:[%s2146_s16 + $0xa0] sm:$0xff] (%p1636_p6), %v1201_v20 }
 0x13e   : > { %v912_v50 = vmul.f32 %v883_v48, %v832_v35  ;;  %v977_v55 = vmul.f32 %v883_v48, %v720_v34  ;;  %v847_v51 = vpop.permute.xlu1 %846  ;;  %1224 = vst [vmem:[%s2146_s16 + $0x150] sm:$0xff] (%p1636_p6), %v1223_v29 }
 0x13f   : > { %v926_v49 = vadd.f32 %v910_v44, %v814_v40  ;;  %v991_v36 = vsub.f32 %v959_v41, %v975_v38  ;;  %v903_v57 = vmul.f32 %v847_v51, %v823_v8  ;;  %v968_v59 = vmul.f32 %v847_v51, %v711_v7 }
 0x140   : > { %v928_v15 = vadd.f32 %v912_v50, %v816_v45  ;;  %v993_v43 = vsub.f32 %v961_v46, %v977_v55  ;;  %v820_v7 = vmul.f32 %v2039_v23, %v724_v30  ;;  %v965_v8 = vmul.f32 %v836_v31, %v2039_v23  ;;  %v1434_v23 = vld [vmem:[%s2289_s0 + $0x34] sm:$0x3] }
 0x141   : > { %1465 = vst.msk [vmem:[%s1822_s7 + $0xc8] sm:$0xff] %vm589_vm0, %v926_v49  ;;  %v919_v11 = vadd.f32 %v903_v57, %v807_v54  ;;  %v984_v10 = vsub.f32 %v952_v17, %v968_v59  ;;  %v812_v45 = vmul.f32 %v1940_v33, %v716_v21  ;;  %v957_v46 = vmul.f32 %v828_v37, %v1940_v33  ;;  %v1437_v57 = vld [vmem:[%s2289_s0 + $0x3a] sm:$0x3] }
 0x142   : > { %1481 = vst.msk [vmem:[%s1822_s7 + $0x1c8] sm:$0xff] %vm589_vm0, %v991_v36  ;;  %v719_v36 = vperm.slane %v1434_v23, 0  ;;  %v831_v50 = vperm.slane %v1434_v23, 1  ;;  %v1265_v23 = vld [vmem:[%s1822_s7 + $0x150] sm:$0xff] (%p1636_p6) }
 0x143   : > { %1467 = vst.msk [vmem:[%s1822_s7 + $0xd8] sm:$0xff] %vm589_vm0, %v928_v15 }
 0x144   : > { %1483 = vst.msk [vmem:[%s1822_s7 + $0x1d8] sm:$0xff] %vm589_vm0, %v993_v43  ;;  %v887_v52 = vpop.permute.xlu0 %886  ;;  %v815_v55 = vmul.f32 %v1951_v42, %v719_v36  ;;  %v960_v51 = vmul.f32 %v831_v50, %v1951_v42 }
 0x145   : > { %1458 = vst.msk [vmem:[%s1822_s7 + $0x90] sm:$0xff] %vm589_vm0, %v919_v11  ;;  %v913_v18 = vmul.f32 %v887_v52, %v833_v1  ;;  %v978_v0 = vmul.f32 %v887_v52, %v721_v5  ;;  %v895_v22 = vpop.permute.xlu2 %894  ;;  %v722_v5 = vperm.slane %v1437_v57, 0  ;;  %v834_v1 = vperm.slane %v1437_v57, 1  ;;  %v1187_v52 = vld [vmem:[%s1822_s7 + $0x18] sm:$0xff] (%p1636_p6) }
 0x146   : > { %1474 = vst.msk [vmem:[%s1822_s7 + $0x190] sm:$0xff] %vm589_vm0, %v984_v10  ;;  %v915_v62 = vmul.f32 %v895_v22, %v835_v9  ;;  %v980_v25 = vmul.f32 %v895_v22, %v723_v6  ;;  %v855_v27 = vpop.permute.xlu1 %854  ;;  %v1203_v22 = vld [vmem:[%s1822_s7 + $0x58] sm:$0xff] (%p1636_p6) }
 0x147   : > { %v929_v26 = vadd.f32 %v913_v18, %v817_v16  ;;  %v994_v24 = vsub.f32 %v962_v63, %v978_v0  ;;  %v905_v14 = vmul.f32 %v855_v27, %v825_v13  ;;  %v970_v61 = vmul.f32 %v855_v27, %v713_v12  ;;  %v1183_v12 = vld [vmem:[%s1822_s7 + $0x8] sm:$0xff] (%p1636_p6)  ;;  %v1185_v13 = vld [vmem:[%s1822_s7 + $0x10] sm:$0xff] (%p1636_p6)  ;;  %v1189_v16 = vld [vmem:[%s1822_s7 + $0x20] sm:$0xff] (%p1636_p6)  ;;  %1188 = vst [vmem:[%s2146_s16 + $0x30] sm:$0xff] (%p1636_p6), %v1187_v52 }
 0x148   : > { %v931_v32 = vadd.f32 %v915_v62, %v819_v19  ;;  %v996_v53 = vsub.f32 %v964_v4, %v980_v25  ;;  %v818_v43 = vmul.f32 %v1964_v56, %v722_v5  ;;  %v963_v42 = vmul.f32 %v834_v1, %v1964_v56  ;;  %v1181_v56 = vld [vmem:[%s1822_s7] sm:$0xff] (%p1636_p6)  ;;  %1184 = vst [vmem:[%s2146_s16 + $0x10] sm:$0xff] (%p1636_p6), %v1183_v12  ;;  %v1191_v63 = vld [vmem:[%s1822_s7 + $0x28] sm:$0xff] (%p1636_p6)  ;;  %v1193_v18 = vld [vmem:[%s1822_s7 + $0x30] sm:$0xff] (%p1636_p6) }
 0x149   : > { %1468 = vst.msk [vmem:[%s1822_s7 + $0xe0] sm:$0xff] %vm589_vm0, %v929_v26  ;;  %v921_v34 = vadd.f32 %v905_v14, %v809_v2  ;;  %v986_v35 = vsub.f32 %v954_v28, %v970_v61  ;;  %v1195_v0 = vld [vmem:[%s1822_s7 + $0x38] sm:$0xff] (%p1636_p6)  ;;  %v1197_v19 = vld [vmem:[%s1822_s7 + $0x40] sm:$0xff] (%p1636_p6)  ;;  %v1199_v4 = vld [vmem:[%s1822_s7 + $0x48] sm:$0xff] (%p1636_p6) }
 0x14a   : > { %1484 = vst.msk [vmem:[%s1822_s7 + $0x1e0] sm:$0xff] %vm589_vm0, %v994_v24  ;;  %v1205_v26 = vld [vmem:[%s1822_s7 + $0x60] sm:$0xff] (%p1636_p6)  ;;  %v1207_v24 = vld [vmem:[%s1822_s7 + $0x68] sm:$0xff] (%p1636_p6)  ;;  %v1209_v62 = vld [vmem:[%s1822_s7 + $0x70] sm:$0xff] (%p1636_p6) }
 0x14b   : > { %1470 = vst.msk [vmem:[%s1822_s7 + $0xf0] sm:$0xff] %vm589_vm0, %v931_v32  ;;  %v1211_v25 = vld [vmem:[%s1822_s7 + $0x78] sm:$0xff] (%p1636_p6)  ;;  %v1213_v27 = vld [vmem:[%s1822_s7 + $0x80] sm:$0xff] (%p1636_p6)  ;;  %v1215_v2 = vld [vmem:[%s1822_s7 + $0x88] sm:$0xff] (%p1636_p6) }
 0x14c   : > { %1486 = vst.msk [vmem:[%s1822_s7 + $0x1f0] sm:$0xff] %vm589_vm0, %v996_v53  ;;  %v899_v39 = vpop.permute.xlu0 %898  ;;  %v1217_v28 = vld [vmem:[%s1822_s7 + $0x90] sm:$0xff] (%p1636_p6)  ;;  %v1219_v14 = vld [vmem:[%s1822_s7 + $0x98] sm:$0xff] (%p1636_p6)  ;;  %v1229_v32 = vld [vmem:[%s1822_s7 + $0xc0] sm:$0xff] (%p1636_p6) }
 0x14d   : > { %1460 = vst.msk [vmem:[%s1822_s7 + $0xa0] sm:$0xff] %vm589_vm0, %v921_v34  ;;  %v916_v60 = vmul.f32 %v899_v39, %v836_v31  ;;  %v981_v40 = vmul.f32 %v899_v39, %v724_v30  ;;  %v1225_v30 = vld [vmem:[%s1822_s7 + $0xb0] sm:$0xff] (%p1636_p6)  ;;  %v1231_v53 = vld [vmem:[%s1822_s7 + $0xc8] sm:$0xff] (%p1636_p6) }
 0x14e   : > { %1476 = vst.msk [vmem:[%s1822_s7 + $0x1a0] sm:$0xff] %vm589_vm0, %v986_v35  ;;  %v867_v38 = vpop.permute.xlu1 %866  ;;  %v1235_v35 = vld [vmem:[%s1822_s7 + $0xd8] sm:$0xff] (%p1636_p6) }
 0x14f   : > { %v932_v41 = vadd.f32 %v916_v60, %v820_v7  ;;  %v997_v44 = vsub.f32 %v965_v8, %v981_v40  ;;  %v908_v47 = vmul.f32 %v867_v38, %v828_v37  ;;  %v973_v48 = vmul.f32 %v867_v38, %v716_v21  ;;  %1182 = vst [vmem:[%s2146_s16] sm:$0xff] (%p1636_p6), %v1181_v56  ;;  %v1245_v8 = vld [vmem:[%s1822_s7 + $0x100] sm:$0xff] (%p1636_p6)  ;;  %v1247_v60 = vld [vmem:[%s1822_s7 + $0x108] sm:$0xff] (%p1636_p6)  ;;  %v1249_v40 = vld [vmem:[%s1822_s7 + $0x110] sm:$0xff] (%p1636_p6) }
 0x150   : > { %1186 = vst [vmem:[%s2146_s16 + $0x20] sm:$0xff] (%p1636_p6), %v1185_v13  ;;  %v1237_v21 = vld [vmem:[%s1822_s7 + $0xe0] sm:$0xff] (%p1636_p6)  ;;  %v1255_v38 = vld [vmem:[%s1822_s7 + $0x128] sm:$0xff] (%p1636_p6) }
 0x151   : > { %1471 = vst.msk [vmem:[%s1822_s7 + $0xf8] sm:$0xff] %vm589_vm0, %v932_v41  ;;  %v924_v3 = vadd.f32 %v908_v47, %v812_v45  ;;  %v989_v49 = vsub.f32 %v957_v46, %v973_v48  ;;  %v1251_v41 = vld [vmem:[%s1822_s7 + $0x118] sm:$0xff] (%p1636_p6)  ;;  %v1257_v45 = vld [vmem:[%s1822_s7 + $0x130] sm:$0xff] (%p1636_p6)  ;;  %v1261_v47 = vld [vmem:[%s1822_s7 + $0x140] sm:$0xff] (%p1636_p6) }
 0x152   : > { %1487 = vst.msk [vmem:[%s1822_s7 + $0x1f8] sm:$0xff] %vm589_vm0, %v997_v44  ;;  %v1241_v39 = vld [vmem:[%s1822_s7 + $0xf0] sm:$0xff] (%p1636_p6)  ;;  %v1253_v44 = vld [vmem:[%s1822_s7 + $0x120] sm:$0xff] (%p1636_p6)  ;;  %v1259_v46 = vld [vmem:[%s1822_s7 + $0x138] sm:$0xff] (%p1636_p6) }
 0x153   : > { %1463 = vst.msk [vmem:[%s1822_s7 + $0xb8] sm:$0xff] %vm589_vm0, %v924_v3  ;;  %v1263_v48 = vld [vmem:[%s1822_s7 + $0x148] sm:$0xff] (%p1636_p6)  ;;  %v1267_v3 = vld [vmem:[%s1822_s7 + $0x158] sm:$0xff] (%p1636_p6) }
 0x154   : > { %1479 = vst.msk [vmem:[%s1822_s7 + $0x1b8] sm:$0xff] %vm589_vm0, %v989_v49  ;;  %v1221_v61 = vld [vmem:[%s1822_s7 + $0xa0] sm:$0xff] (%p1636_p6) }
 0x155   : > { %1190 = vst [vmem:[%s2146_s16 + $0x40] sm:$0xff] (%p1636_p6), %v1189_v16  ;;  %v1269_v49 = vld [vmem:[%s1822_s7 + $0x160] sm:$0xff] (%p1636_p6) }
 0x156   : > { %v879_v33 = vpop.permute.xlu1 %878  ;;  %1192 = vst [vmem:[%s2146_s16 + $0x50] sm:$0xff] (%p1636_p6), %v1191_v63  ;;  %v1285_v57 = vld [vmem:[%s1822_s7 + $0x1a0] sm:$0xff] (%p1636_p6) }
 0x157   : > { %v911_v54 = vmul.f32 %v879_v33, %v831_v50  ;;  %v976_v17 = vmul.f32 %v879_v33, %v719_v36  ;;  %1194 = vst [vmem:[%s2146_s16 + $0x60] sm:$0xff] (%p1636_p6), %v1193_v18  ;;  %v1271_v36 = vld [vmem:[%s1822_s7 + $0x168] sm:$0xff] (%p1636_p6)  ;;  %v1273_v50 = vld [vmem:[%s1822_s7 + $0x170] sm:$0xff] (%p1636_p6)  ;;  %v1275_v33 = vld [vmem:[%s1822_s7 + $0x178] sm:$0xff] (%p1636_p6) }
 0x158   : > { %1196 = vst [vmem:[%s2146_s16 + $0x70] sm:$0xff] (%p1636_p6), %v1195_v0  ;;  %v1243_v7 = vld [vmem:[%s1822_s7 + $0xf8] sm:$0xff] (%p1636_p6) }
 0x159   : > { %v927_v59 = vadd.f32 %v911_v54, %v815_v55  ;;  %v992_v58 = vsub.f32 %v960_v51, %v976_v17  ;;  %1198 = vst [vmem:[%s2146_s16 + $0x80] sm:$0xff] (%p1636_p6), %v1197_v19  ;;  %v1277_v55 = vld [vmem:[%s1822_s7 + $0x180] sm:$0xff] (%p1636_p6)  ;;  %v1279_v51 = vld [vmem:[%s1822_s7 + $0x188] sm:$0xff] (%p1636_p6)  ;;  %v1281_v54 = vld [vmem:[%s1822_s7 + $0x190] sm:$0xff] (%p1636_p6) }
 0x15a   : > { %1200 = vst [vmem:[%s2146_s16 + $0x90] sm:$0xff] (%p1636_p6), %v1199_v4  ;;  %v1227_v31 = vld [vmem:[%s1822_s7 + $0xb8] sm:$0xff] (%p1636_p6) }
 0x15b   : > { %1466 = vst.msk [vmem:[%s1822_s7 + $0xd0] sm:$0xff] %vm589_vm0, %v927_v59  ;;  %v1283_v17 = vld [vmem:[%s1822_s7 + $0x198] sm:$0xff] (%p1636_p6)  ;;  %v1287_v59 = vld [vmem:[%s1822_s7 + $0x1a8] sm:$0xff] (%p1636_p6) }
 0x15c   : > { %1482 = vst.msk [vmem:[%s1822_s7 + $0x1d0] sm:$0xff] %vm589_vm0, %v992_v58  ;;  %v1289_v58 = vld [vmem:[%s1822_s7 + $0x1b0] sm:$0xff] (%p1636_p6) }
 0x15d   : > { %1204 = vst [vmem:[%s2146_s16 + $0xb0] sm:$0xff] (%p1636_p6), %v1203_v22 }
 0x15e   : > { %v891_v15 = vpop.permute.xlu1 %890  ;;  %1206 = vst [vmem:[%s2146_s16 + $0xc0] sm:$0xff] (%p1636_p6), %v1205_v26 }
 0x15f   : > { %v914_v6 = vmul.f32 %v891_v15, %v834_v1  ;;  %v979_v9 = vmul.f32 %v891_v15, %v722_v5  ;;  %1208 = vst [vmem:[%s2146_s16 + $0xd0] sm:$0xff] (%p1636_p6), %v1207_v24  ;;  %v1291_v5 = vld [vmem:[%s1822_s7 + $0x1b8] sm:$0xff] (%p1636_p6)  ;;  %v1293_v1 = vld [vmem:[%s1822_s7 + $0x1c0] sm:$0xff] (%p1636_p6)  ;;  %v1295_v15 = vld [vmem:[%s1822_s7 + $0x1c8] sm:$0xff] (%p1636_p6) }
 0x160   : > { %1023 = sbr.rel (!%p1636_p6) target bundleno = 403 (0x193), region = 70  ;;  %1210 = vst [vmem:[%s2146_s16 + $0xe0] sm:$0xff] (%p1636_p6), %v1209_v62 }
 0x161   : > { %v930_v11 = vadd.f32 %v914_v6, %v818_v43  ;;  %v995_v10 = vsub.f32 %v963_v42, %v979_v9  ;;  %1212 = vst [vmem:[%s2146_s16 + $0xf0] sm:$0xff] (%p1636_p6), %v1211_v25  ;;  %v1299_v42 = vld [vmem:[%s1822_s7 + $0x1d8] sm:$0xff] (%p1636_p6)  ;;  %v1301_v6 = vld [vmem:[%s1822_s7 + $0x1e0] sm:$0xff] (%p1636_p6) }
 0x162   : > { %1214 = vst [vmem:[%s2146_s16 + $0x100] sm:$0xff] (%p1636_p6), %v1213_v27  ;;  %v1233_v34 = vld [vmem:[%s1822_s7 + $0xd0] sm:$0xff] (%p1636_p6) }
 0x163   : > { %1469 = vst.msk [vmem:[%s1822_s7 + $0xe8] sm:$0xff] %vm589_vm0, %v930_v11  ;;  %v1297_v43 = vld [vmem:[%s1822_s7 + $0x1d0] sm:$0xff] (%p1636_p6) }
 0x164   : > { %1485 = vst.msk [vmem:[%s1822_s7 + $0x1e8] sm:$0xff] %vm589_vm0, %v995_v10  ;;  %v1305_v11 = vld [vmem:[%s1822_s7 + $0x1f0] sm:$0xff] (%p1636_p6)  ;;  %v1307_v10 = vld [vmem:[%s1822_s7 + $0x1f8] sm:$0xff] (%p1636_p6) }
 0x165   : > { %1216 = vst [vmem:[%s2146_s16 + $0x110] sm:$0xff] %v1215_v2 }
 0x166   : > { %1218 = vst [vmem:[%s2146_s16 + $0x120] sm:$0xff] %v1217_v28 }
 0x167   : > { %1220 = vst [vmem:[%s2146_s16 + $0x130] sm:$0xff] %v1219_v14 }
 0x168   : > { %1222 = vst [vmem:[%s2146_s16 + $0x140] sm:$0xff] %v1221_v61 }
 0x169   : > { %1226 = vst [vmem:[%s2146_s16 + $0x160] sm:$0xff] %v1225_v30 }
 0x16a   : > { %1228 = vst [vmem:[%s2146_s16 + $0x170] sm:$0xff] %v1227_v31  ;;  %v1239_v37 = vld [vmem:[%s1822_s7 + $0xe8] sm:$0xff] }
 0x16b   : > { %1230 = vst [vmem:[%s2146_s16 + $0x180] sm:$0xff] %v1229_v32  ;;  %v1303_v9 = vld [vmem:[%s1822_s7 + $0x1e8] sm:$0xff] }
 0x16c   : > { %1232 = vst [vmem:[%s2146_s16 + $0x190] sm:$0xff] %v1231_v53 }
 0x16d   : > { %1234 = vst [vmem:[%s2146_s16 + $0x1a0] sm:$0xff] %v1233_v34 }
 0x16e   : > { %1236 = vst [vmem:[%s2146_s16 + $0x1b0] sm:$0xff] %v1235_v35 }
 0x16f   : > { %1238 = vst [vmem:[%s2146_s16 + $0x1c0] sm:$0xff] %v1237_v21 }
 0x170   : > { %1240 = vst [vmem:[%s2146_s16 + $0x1d0] sm:$0xff] %v1239_v37 }
 0x171   : > { %1242 = vst [vmem:[%s2146_s16 + $0x1e0] sm:$0xff] %v1241_v39 }
 0x172   : > { %1244 = vst [vmem:[%s2146_s16 + $0x1f0] sm:$0xff] %v1243_v7 }
 0x173   : > { %1246 = vst [vmem:[%s2146_s16 + $0x200] sm:$0xff] %v1245_v8 }
 0x174   : > { %1248 = vst [vmem:[%s2146_s16 + $0x210] sm:$0xff] %v1247_v60 }
 0x175   : > { %1250 = vst [vmem:[%s2146_s16 + $0x220] sm:$0xff] %v1249_v40 }
 0x176   : > { %1252 = vst [vmem:[%s2146_s16 + $0x230] sm:$0xff] %v1251_v41 }
 0x177   : > { %1254 = vst [vmem:[%s2146_s16 + $0x240] sm:$0xff] %v1253_v44 }
 0x178   : > { %1256 = vst [vmem:[%s2146_s16 + $0x250] sm:$0xff] %v1255_v38 }
 0x179   : > { %1258 = vst [vmem:[%s2146_s16 + $0x260] sm:$0xff] %v1257_v45 }
 0x17a   : > { %1260 = vst [vmem:[%s2146_s16 + $0x270] sm:$0xff] %v1259_v46 }
 0x17b   : > { %1262 = vst [vmem:[%s2146_s16 + $0x280] sm:$0xff] %v1261_v47 }
 0x17c   : > { %1264 = vst [vmem:[%s2146_s16 + $0x290] sm:$0xff] %v1263_v48 }
 0x17d   : > { %1266 = vst [vmem:[%s2146_s16 + $0x2a0] sm:$0xff] %v1265_v23 }
 0x17e   : > { %1268 = vst [vmem:[%s2146_s16 + $0x2b0] sm:$0xff] %v1267_v3 }
 0x17f   : > { %1270 = vst [vmem:[%s2146_s16 + $0x2c0] sm:$0xff] %v1269_v49 }
 0x180   : > { %1272 = vst [vmem:[%s2146_s16 + $0x2d0] sm:$0xff] %v1271_v36 }
 0x181   : > { %1274 = vst [vmem:[%s2146_s16 + $0x2e0] sm:$0xff] %v1273_v50 }
 0x182   : > { %1276 = vst [vmem:[%s2146_s16 + $0x2f0] sm:$0xff] %v1275_v33 }
 0x183   : > { %1278 = vst [vmem:[%s2146_s16 + $0x300] sm:$0xff] %v1277_v55 }
 0x184   : > { %1280 = vst [vmem:[%s2146_s16 + $0x310] sm:$0xff] %v1279_v51 }
 0x185   : > { %1282 = vst [vmem:[%s2146_s16 + $0x320] sm:$0xff] %v1281_v54 }
 0x186   : > { %1284 = vst [vmem:[%s2146_s16 + $0x330] sm:$0xff] %v1283_v17 }
 0x187   : > { %1286 = vst [vmem:[%s2146_s16 + $0x340] sm:$0xff] %v1285_v57 }
 0x188   : > { %1288 = vst [vmem:[%s2146_s16 + $0x350] sm:$0xff] %v1287_v59 }
 0x189   : > { %1290 = vst [vmem:[%s2146_s16 + $0x360] sm:$0xff] %v1289_v58 }
 0x18a   : > { %1292 = vst [vmem:[%s2146_s16 + $0x370] sm:$0xff] %v1291_v5 }
 0x18b   : > { %1294 = vst [vmem:[%s2146_s16 + $0x380] sm:$0xff] %v1293_v1 }
 0x18c   : > { %1296 = vst [vmem:[%s2146_s16 + $0x390] sm:$0xff] %v1295_v15 }
 0x18d   : > { %1298 = vst [vmem:[%s2146_s16 + $0x3a0] sm:$0xff] %v1297_v43 }
 0x18e   : > { %1300 = vst [vmem:[%s2146_s16 + $0x3b0] sm:$0xff] %v1299_v42 }
 0x18f   : > { %1302 = vst [vmem:[%s2146_s16 + $0x3c0] sm:$0xff] %v1301_v6 }
 0x190   : > { %1304 = vst [vmem:[%s2146_s16 + $0x3d0] sm:$0xff] %v1303_v9 }
 0x191   : > { %1306 = vst [vmem:[%s2146_s16 + $0x3e0] sm:$0xff] %v1305_v11 }
 0x192   : > { %1308 = vst [vmem:[%s2146_s16 + $0x3f0] sm:$0xff] %v1307_v10 }
 0x193 PF: > { %s12_s13 = sadd.s32 1, %s1582_s13   ;;  %s2293_s9 = smov %s1570_s10 }
 0x194   : > { %p9_p11 = scmp.ge.s32.totalorder %s12_s13, 4   ;;  %s2294_s10 = smov %s1641_s19 }
 0x195   : > { %s2295_s11 = smov %s1578_s12  ;;  %s2296_s12 = smov %s2298_s14 }
 0x196   :  { %11 = sbr.rel (!%p9_p11) target bundleno = 3 (0x3), region = 150 }

</bundles_post_ra>
